<compile_context>
chip_gen: v6e
topology: v6e:2x2x1
jax: 0.10.0
libtpu: 0.0.40
codegen_flags: <defaults>
</compile_context>

<pallas_src>
import jax
import jax.numpy as jnp
from jax.experimental import pallas as pl
from jax.experimental.pallas import tpu as pltpu

D_STATE = 200          # state feature dim
D_ACTION = 100         # action feature dim
D_IN = D_STATE + D_ACTION   # 100*3, matches nn.Linear(100*3, 100)
D_HID = 100
D_HID2 = 2 * D_HID     # fused actor||critic hidden width


# ---------------------------------------------------------------------------
# Kernel: one row-tile of the fused actor+critic MLP.
#   xs_ref: (1, 200) [broadcast path] or (tm, 200) [flat path]
#   xa_ref: (tile, 100)
# ---------------------------------------------------------------------------
def _fused_actor_critic_kernel(xs_ref, xa_ref,
                               w1s_ref, w1a_ref, b1_ref,
                               w2_ref, b2_ref,
                               w3_ref, b3_ref,
                               out_ref):
    # Layer 1: split-K matmul (state part + action part); actor||critic fused
    # along the output (N) dimension -> (tile, 200).  When xs is a single row
    # per batch element, the state projection broadcasts over the tile.
    h1 = jnp.dot(xs_ref[...], w1s_ref[...], preferred_element_type=jnp.float32)
    h1 = h1 + jnp.dot(xa_ref[...], w1a_ref[...],
                      preferred_element_type=jnp.float32)
    h1 = jnp.tanh(h1 + b1_ref[...])

    # Layer 2: block-diagonal fused weight keeps the two branches independent.
    h2 = jnp.tanh(jnp.dot(h1, w2_ref[...],
                          preferred_element_type=jnp.float32) + b2_ref[...])

    # Layer 3: fused 2-wide head (col 0 = actor, col 1 = critic) + sigmoid.
    y = jnp.dot(h2, w3_ref[...], preferred_element_type=jnp.float32) + b3_ref[...]
    out_ref[...] = 1.0 / (1.0 + jnp.exp(-y))


# ---------------------------------------------------------------------------
# Host-side helpers.
# ---------------------------------------------------------------------------
def _round_up(n, m):
    return ((n + m - 1) // m) * m


def _choose_tile(n):
    """Largest useful row tile: single tile up to 1024 rows, else 512-row tiles
    (always a multiple of 8 so the sublane constraint holds)."""
    if n <= 1024:
        return max(8, _round_up(n, 8))
    return 512


def _const_spec(arr):
    zero = (0,) * arr.ndim
    return pl.BlockSpec(arr.shape, lambda *_: zero)


def pack_params(p):
    """Fuse actor/critic per-layer weights into combined kernel weights."""
    w1 = jnp.concatenate([p["aw1"], p["cw1"]], axis=1)        # (300, 200)
    w1s, w1a = w1[:D_STATE], w1[D_STATE:]                     # (200,200),(100,200)
    b1 = jnp.concatenate([p["ab1"], p["cb1"]], axis=1)        # (1, 200)

    w2 = jnp.zeros((D_HID2, D_HID2), jnp.float32)
    w2 = w2.at[:D_HID, :D_HID].set(p["aw2"])
    w2 = w2.at[D_HID:, D_HID:].set(p["cw2"])                  # block-diag
    b2 = jnp.concatenate([p["ab2"], p["cb2"]], axis=1)        # (1, 200)

    w3 = jnp.zeros((D_HID2, 2), jnp.float32)
    w3 = w3.at[:D_HID, 0:1].set(p["aw3"])
    w3 = w3.at[D_HID:, 1:2].set(p["cw3"])                     # (200, 2)
    b3 = jnp.concatenate([p["ab3"], p["cb3"]], axis=1)        # (1, 2)
    return (w1s, w1a, b1, w2, b2, w3, b3)


# ---------------------------------------------------------------------------
# Path A: state rank < action rank.  No HBM broadcast of state: grid is
# (batch, action_tiles); state enters as one (1, 200) row per batch element.
# ---------------------------------------------------------------------------
def _run_broadcast(state2d, action3d, packed):
    """state2d: (B, 200); action3d: (B, A, 100).  Returns (B, A, 1) x2."""
    w1s, w1a, b1, w2, b2, w3, b3 = packed
    B, A = action3d.shape[0], action3d.shape[1]
    ta = _choose_tile(A)
    a_pad = _round_up(A, ta)
    if a_pad != A:
        action3d = jnp.pad(action3d, ((0, 0), (0, a_pad - A), (0, 0)))
    state3d = state2d.reshape(B, 1, D_STATE)

    out = pl.pallas_call(
        _fused_actor_critic_kernel,
        out_shape=jax.ShapeDtypeStruct((B, a_pad, 2), jnp.float32),
        grid=(B, a_pad // ta),
        in_specs=[pl.BlockSpec((None, 1, D_STATE), lambda b, j: (b, 0, 0)),
                  pl.BlockSpec((None, ta, D_ACTION), lambda b, j: (b, j, 0)),
                  _const_spec(w1s), _const_spec(w1a), _const_spec(b1),
                  _const_spec(w2), _const_spec(b2),
                  _const_spec(w3), _const_spec(b3)],
        out_specs=pl.BlockSpec((None, ta, 2), lambda b, j: (b, j, 0)),
        compiler_params=pltpu.CompilerParams(
            dimension_semantics=("parallel", "parallel")),
    )(state3d, action3d, w1s, w1a, b1, w2, b2, w3, b3)

    return out[:, :A, 0:1], out[:, :A, 1:2]


# ---------------------------------------------------------------------------
# Path B: state rank == action rank (row-matched state).  Flattened 1D grid.
# ---------------------------------------------------------------------------
def _run_flat(xs, xa, packed):
    """xs: (M, 200), xa: (M, 100).  Returns (M, 1) x2."""
    w1s, w1a, b1, w2, b2, w3, b3 = packed
    M = xs.shape[0]
    tm = _choose_tile(M)
    m_pad = _round_up(M, tm)
    if m_pad != M:
        xs = jnp.pad(xs, ((0, m_pad - M), (0, 0)))
        xa = jnp.pad(xa, ((0, m_pad - M), (0, 0)))

    out = pl.pallas_call(
        _fused_actor_critic_kernel,
        out_shape=jax.ShapeDtypeStruct((m_pad, 2), jnp.float32),
        grid=(m_pad // tm,),
        in_specs=[pl.BlockSpec((tm, D_STATE), lambda i: (i, 0)),
                  pl.BlockSpec((tm, D_ACTION), lambda i: (i, 0)),
                  _const_spec(w1s), _const_spec(w1a), _const_spec(b1),
                  _const_spec(w2), _const_spec(b2),
                  _const_spec(w3), _const_spec(b3)],
        out_specs=pl.BlockSpec((tm, 2), lambda i: (i, 0)),
        compiler_params=pltpu.CompilerParams(
            dimension_semantics=("parallel",)),
    )(xs, xa, w1s, w1a, b1, w2, b2, w3, b3)

    return out[:M, 0:1], out[:M, 1:2]


# ---------------------------------------------------------------------------
# Net.forward replica.
# ---------------------------------------------------------------------------
def net_forward(state_input, action_input, params):
    packed = pack_params(params)
    lead_shape = action_input.shape[:-1]
    xa = action_input.astype(jnp.float32)
    xs = state_input.astype(jnp.float32)

    if state_input.ndim < action_input.ndim:
        # Broadcast path: state is (B, 200), action is (B, ..., 100).
        B = action_input.shape[0]
        a3 = xa.reshape(B, -1, D_ACTION)
        act3, q3 = _run_broadcast(xs, a3, packed)
        act_probs = act3.reshape(lead_shape + (1,))
        q_actions = q3.reshape(lead_shape + (1,))
    else:
        # Row-matched path: flatten both and run the 1D-grid kernel.
        act_flat, q_flat = _run_flat(xs.reshape(-1, D_STATE),
                                     xa.reshape(-1, D_ACTION), packed)
        act_probs = act_flat.reshape(lead_shape + (1,))
        q_actions = q_flat.reshape(lead_shape + (1,))
    return act_probs, q_actions


# ---------------------------------------------------------------------------
# Parameter init (mimics nn.Linear default: uniform +-1/sqrt(fan_in)),
# stored as (in, out) so the kernel computes x @ W.
# ---------------------------------------------------------------------------
def init_params(key):
    def linear(key, fan_in, fan_out):
        k1, k2 = jax.random.split(key)
        bound = 1.0 / jnp.sqrt(fan_in)
        w = jax.random.uniform(k1, (fan_in, fan_out), jnp.float32, -bound, bound)
        b = jax.random.uniform(k2, (1, fan_out), jnp.float32, -bound, bound)
        return w, b

    keys = jax.random.split(key, 6)
    aw1, ab1 = linear(keys[0], D_IN, D_HID)
    aw2, ab2 = linear(keys[1], D_HID, D_HID)
    aw3, ab3 = linear(keys[2], D_HID, 1)
    cw1, cb1 = linear(keys[3], D_IN, D_HID)
    cw2, cb2 = linear(keys[4], D_HID, D_HID)
    cw3, cb3 = linear(keys[5], D_HID, 1)
    return dict(aw1=aw1, ab1=ab1, aw2=aw2, ab2=ab2, aw3=aw3, ab3=ab3,
                cw1=cw1, cb1=cb1, cw2=cw2, cb2=cb2, cw3=cw3, cb3=cb3)


# ---------------------------------------------------------------------------
# Pure-JAX reference (unfused weights) for correctness checking.
# ---------------------------------------------------------------------------
def _broadcast_state(state_input, action_input):
    if state_input.ndim < action_input.ndim:
        extra = action_input.ndim - state_input.ndim
        s = state_input.reshape(
            state_input.shape[:1] + (1,) * extra + state_input.shape[1:])
        s = jnp.broadcast_to(
            s, action_input.shape[:-1] + (state_input.shape[-1],))
        return s
    return state_input


def _reference(state_input, action_input, params):
    s = _broadcast_state(state_input, action_input)
    x = jnp.concatenate([s, action_input], axis=-1)

    def mlp(x, w1, b1, w2, b2, w3, b3):
        h = jnp.tanh(x @ w1 + b1[0])
        h = jnp.tanh(h @ w2 + b2[0])
        return jax.nn.sigmoid(h @ w3 + b3[0])

    act = mlp(x, params["aw1"], params["ab1"], params["aw2"], params["ab2"],
              params["aw3"], params["ab3"])
    q = mlp(x, params["cw1"], params["cb1"], params["cw2"], params["cb2"],
            params["cw3"], params["cb3"])
    return act, q


if __name__ == "__main__":
    key = jax.random.PRNGKey(0)
    kp, ks1, ka1, ks2, ka2, ks3, ka3, ks4, ka4, ks5, ka5 = jax.random.split(key, 11)
    params = init_params(kp)

    def check(state_input, action_input):
        act_probs, q_actions = net_forward(state_input, action_input, params)
        act_probs = jax.block_until_ready(act_probs)
        q_actions = jax.block_until_ready(q_actions)
        ref_act, ref_q = _reference(state_input, action_input, params)
        assert act_probs.shape == action_input.shape[:-1] + (1,)
        assert q_actions.shape == action_input.shape[:-1] + (1,)
        assert jnp.allclose(act_probs, ref_act, atol=3e-5, rtol=1e-4)
        assert jnp.allclose(q_actions, ref_q, atol=3e-5, rtol=1e-4)

    # Case 1: small 3-D action (batch=2, 8 candidate actions) -> tiny tiles.
    check(jax.random.normal(ks1, (2, D_STATE), jnp.float32),
          jax.random.normal(ka1, (2, 8, D_ACTION), jnp.float32))

    # Case 2: 3-D action (batch=4, 300 candidates) -> one 304-row tile/batch.
    check(jax.random.normal(ks2, (4, D_STATE), jnp.float32),
          jax.random.normal(ka2, (4, 300, D_ACTION), jnp.float32))

    # Case 3: 4-D action (batch=2, 3x5 candidate grid) -> exercises the
    #         double-unsqueeze/expand branch of the original forward.
    check(jax.random.normal(ks3, (2, D_STATE), jnp.float32),
          jax.random.normal(ka3, (2, 3, 5, D_ACTION), jnp.float32))

    # Case 4: many candidates (batch=2, 1300) -> multi-tile grid with padding.
    check(jax.random.normal(ks4, (2, D_STATE), jnp.float32),
          jax.random.normal(ka4, (2, 1300, D_ACTION), jnp.float32))

    # Case 5: equal-rank state/action -> flattened 1-D-grid path.
    check(jax.random.normal(ks5, (3, 7, D_STATE), jnp.float32),
          jax.random.normal(ka5, (3, 7, D_ACTION), jnp.float32))

    print("KERNEL_OK")
</pallas_src>

<mosaic_0001>
module attributes {stable_mosaic.version = 11 : i64} {
  func.func @_fused_actor_critic_kernel(%arg0: i32, %arg1: i32, %arg2: memref<1x1x200xf32, #tpu.memory_space<vmem>>, %arg3: memref<1x8x100xf32, #tpu.memory_space<vmem>>, %arg4: memref<200x200xf32, #tpu.memory_space<vmem>>, %arg5: memref<100x200xf32, #tpu.memory_space<vmem>>, %arg6: memref<1x200xf32, #tpu.memory_space<vmem>>, %arg7: memref<200x200xf32, #tpu.memory_space<vmem>>, %arg8: memref<1x200xf32, #tpu.memory_space<vmem>>, %arg9: memref<200x2xf32, #tpu.memory_space<vmem>>, %arg10: memref<1x2xf32, #tpu.memory_space<vmem>>, %arg11: memref<1x8x2xf32, #tpu.memory_space<vmem>>) attributes {dimension_semantics = [#tpu.dimension_semantics<parallel>, #tpu.dimension_semantics<parallel>], iteration_bounds = array<i64: 2, 1>, scalar_prefetch = 0 : i64, scratch_operands = 0 : i64, tpu.core_type = #tpu.core_type<tc>, window_params = [{transform_indices = @transform_0, window_bounds = array<i64: 1, 1, 200>}, {transform_indices = @transform_1, window_bounds = array<i64: 1, 8, 100>}, {pipeline_mode = #tpu.pipeline_mode<synchronous>, transform_indices = @transform_2, window_bounds = array<i64: 200, 200>}, {pipeline_mode = #tpu.pipeline_mode<synchronous>, transform_indices = @transform_3, window_bounds = array<i64: 100, 200>}, {pipeline_mode = #tpu.pipeline_mode<synchronous>, transform_indices = @transform_4, window_bounds = array<i64: 1, 200>}, {pipeline_mode = #tpu.pipeline_mode<synchronous>, transform_indices = @transform_5, window_bounds = array<i64: 200, 200>}, {pipeline_mode = #tpu.pipeline_mode<synchronous>, transform_indices = @transform_6, window_bounds = array<i64: 1, 200>}, {pipeline_mode = #tpu.pipeline_mode<synchronous>, transform_indices = @transform_7, window_bounds = array<i64: 200, 2>}, {pipeline_mode = #tpu.pipeline_mode<synchronous>, transform_indices = @transform_8, window_bounds = array<i64: 1, 2>}, {transform_indices = @transform_9, window_bounds = array<i64: 1, 8, 2>}]} {
    %c0 = arith.constant 0 : index
    %c0_0 = arith.constant 0 : index
    %c0_1 = arith.constant 0 : index
    %0 = vector.load %arg2[%c0, %c0_0, %c0_1] : memref<1x1x200xf32, #tpu.memory_space<vmem>>, vector<1x1x200xf32>
    %1 = vector.shape_cast %0 : vector<1x1x200xf32> to vector<1x200xf32>
    %c0_2 = arith.constant 0 : index
    %c0_3 = arith.constant 0 : index
    %2 = vector.load %arg4[%c0_2, %c0_3] : memref<200x200xf32, #tpu.memory_space<vmem>>, vector<200x200xf32>
    %cst = arith.constant dense<0.000000e+00> : vector<1x200xf32>
    %3 = tpu.matmul %1, %2, %cst {dimension_numbers = #tpu.dot_dimension_numbers<[1], [0], [0], [1], [0, 0, 1, 1], [], []>} : vector<1x200xf32>, vector<200x200xf32>, vector<1x200xf32> -> vector<1x200xf32>
    %c0_4 = arith.constant 0 : index
    %c0_5 = arith.constant 0 : index
    %c0_6 = arith.constant 0 : index
    %4 = vector.load %arg3[%c0_4, %c0_5, %c0_6] : memref<1x8x100xf32, #tpu.memory_space<vmem>>, vector<1x8x100xf32>
    %5 = vector.shape_cast %4 : vector<1x8x100xf32> to vector<8x100xf32>
    %c0_7 = arith.constant 0 : index
    %c0_8 = arith.constant 0 : index
    %6 = vector.load %arg5[%c0_7, %c0_8] : memref<100x200xf32, #tpu.memory_space<vmem>>, vector<100x200xf32>
    %cst_9 = arith.constant dense<0.000000e+00> : vector<8x200xf32>
    %7 = tpu.matmul %5, %6, %cst_9 {dimension_numbers = #tpu.dot_dimension_numbers<[1], [0], [0], [1], [0, 0, 1, 1], [], []>} : vector<8x100xf32>, vector<100x200xf32>, vector<8x200xf32> -> vector<8x200xf32>
    %8 = vector.broadcast %3 : vector<1x200xf32> to vector<8x200xf32>
    %9 = arith.addf %8, %7 : vector<8x200xf32>
    %c0_10 = arith.constant 0 : index
    %c0_11 = arith.constant 0 : index
    %10 = vector.load %arg6[%c0_10, %c0_11] : memref<1x200xf32, #tpu.memory_space<vmem>>, vector<1x200xf32>
    %11 = vector.broadcast %10 : vector<1x200xf32> to vector<8x200xf32>
    %12 = arith.addf %9, %11 : vector<8x200xf32>
    %13 = math.tanh %12 : vector<8x200xf32>
    %c0_12 = arith.constant 0 : index
    %c0_13 = arith.constant 0 : index
    %14 = vector.load %arg7[%c0_12, %c0_13] : memref<200x200xf32, #tpu.memory_space<vmem>>, vector<200x200xf32>
    %cst_14 = arith.constant dense<0.000000e+00> : vector<8x200xf32>
    %15 = tpu.matmul %13, %14, %cst_14 {dimension_numbers = #tpu.dot_dimension_numbers<[1], [0], [0], [1], [0, 0, 1, 1], [], []>} : vector<8x200xf32>, vector<200x200xf32>, vector<8x200xf32> -> vector<8x200xf32>
    %c0_15 = arith.constant 0 : index
    %c0_16 = arith.constant 0 : index
    %16 = vector.load %arg8[%c0_15, %c0_16] : memref<1x200xf32, #tpu.memory_space<vmem>>, vector<1x200xf32>
    %17 = vector.broadcast %16 : vector<1x200xf32> to vector<8x200xf32>
    %18 = arith.addf %15, %17 : vector<8x200xf32>
    %19 = math.tanh %18 : vector<8x200xf32>
    %c0_17 = arith.constant 0 : index
    %c0_18 = arith.constant 0 : index
    %20 = vector.load %arg9[%c0_17, %c0_18] : memref<200x2xf32, #tpu.memory_space<vmem>>, vector<200x2xf32>
    %cst_19 = arith.constant dense<0.000000e+00> : vector<8x2xf32>
    %21 = tpu.matmul %19, %20, %cst_19 {dimension_numbers = #tpu.dot_dimension_numbers<[1], [0], [0], [1], [0, 0, 1, 1], [], []>} : vector<8x200xf32>, vector<200x2xf32>, vector<8x2xf32> -> vector<8x2xf32>
    %c0_20 = arith.constant 0 : index
    %c0_21 = arith.constant 0 : index
    %22 = vector.load %arg10[%c0_20, %c0_21] : memref<1x2xf32, #tpu.memory_space<vmem>>, vector<1x2xf32>
    %23 = vector.broadcast %22 : vector<1x2xf32> to vector<8x2xf32>
    %24 = arith.addf %21, %23 : vector<8x2xf32>
    %cst_22 = arith.constant 0.000000e+00 : f32
    %25 = vector.broadcast %cst_22 : f32 to vector<8x2xf32>
    %26 = arith.subf %25, %24 : vector<8x2xf32>
    %27 = math.exp %26 : vector<8x2xf32>
    %cst_23 = arith.constant 1.000000e+00 : f32
    %28 = vector.broadcast %cst_23 : f32 to vector<8x2xf32>
    %29 = arith.addf %28, %27 : vector<8x2xf32>
    %cst_24 = arith.constant 1.000000e+00 : f32
    %30 = vector.broadcast %cst_24 : f32 to vector<8x2xf32>
    %31 = arith.divf %30, %29 : vector<8x2xf32>
    %c0_25 = arith.constant 0 : index
    %c0_26 = arith.constant 0 : index
    %c0_27 = arith.constant 0 : index
    %32 = vector.load %arg11[%c0_25, %c0_26, %c0_27] : memref<1x8x2xf32, #tpu.memory_space<vmem>>, vector<1x8x2xf32>
    %33 = vector.shape_cast %32 : vector<1x8x2xf32> to vector<8x2xf32>
    %34 = vector.shape_cast %31 : vector<8x2xf32> to vector<1x8x2xf32>
    tpu.vector_store %arg11[%c0_25, %c0_26, %c0_27], %34 {strides = array<i32>} : memref<1x8x2xf32, #tpu.memory_space<vmem>>, vector<1x8x2xf32>,
    return
  }
  func.func @transform_0(%arg0: i32, %arg1: i32) -> (i32, i32, i32) {
    %c0_i32 = arith.constant 0 : i32
    %c0_i32_0 = arith.constant 0 : i32
    %c0_i32_1 = arith.constant 0 : i32
    return %arg0, %c0_i32, %c0_i32_0 : i32, i32, i32
  }
  func.func @transform_1(%arg0: i32, %arg1: i32) -> (i32, i32, i32) {
    %c0_i32 = arith.constant 0 : i32
    %c0_i32_0 = arith.constant 0 : i32
    return %arg0, %arg1, %c0_i32 : i32, i32, i32
  }
  func.func @transform_2(%arg0: i32, %arg1: i32) -> (i32, i32) {
    %c0_i32 = arith.constant 0 : i32
    %c0_i32_0 = arith.constant 0 : i32
    %c0_i32_1 = arith.constant 0 : i32
    return %c0_i32, %c0_i32_0 : i32, i32
  }
  func.func @transform_3(%arg0: i32, %arg1: i32) -> (i32, i32) {
    %c0_i32 = arith.constant 0 : i32
    %c0_i32_0 = arith.constant 0 : i32
    %c0_i32_1 = arith.constant 0 : i32
    return %c0_i32, %c0_i32_0 : i32, i32
  }
  func.func @transform_4(%arg0: i32, %arg1: i32) -> (i32, i32) {
    %c0_i32 = arith.constant 0 : i32
    %c0_i32_0 = arith.constant 0 : i32
    %c0_i32_1 = arith.constant 0 : i32
    return %c0_i32, %c0_i32_0 : i32, i32
  }
  func.func @transform_5(%arg0: i32, %arg1: i32) -> (i32, i32) {
    %c0_i32 = arith.constant 0 : i32
    %c0_i32_0 = arith.constant 0 : i32
    %c0_i32_1 = arith.constant 0 : i32
    return %c0_i32, %c0_i32_0 : i32, i32
  }
  func.func @transform_6(%arg0: i32, %arg1: i32) -> (i32, i32) {
    %c0_i32 = arith.constant 0 : i32
    %c0_i32_0 = arith.constant 0 : i32
    %c0_i32_1 = arith.constant 0 : i32
    return %c0_i32, %c0_i32_0 : i32, i32
  }
  func.func @transform_7(%arg0: i32, %arg1: i32) -> (i32, i32) {
    %c0_i32 = arith.constant 0 : i32
    %c0_i32_0 = arith.constant 0 : i32
    %c0_i32_1 = arith.constant 0 : i32
    return %c0_i32, %c0_i32_0 : i32, i32
  }
  func.func @transform_8(%arg0: i32, %arg1: i32) -> (i32, i32) {
    %c0_i32 = arith.constant 0 : i32
    %c0_i32_0 = arith.constant 0 : i32
    %c0_i32_1 = arith.constant 0 : i32
    return %c0_i32, %c0_i32_0 : i32, i32
  }
  func.func @transform_9(%arg0: i32, %arg1: i32) -> (i32, i32, i32) {
    %c0_i32 = arith.constant 0 : i32
    %c0_i32_0 = arith.constant 0 : i32
    return %arg0, %arg1, %c0_i32 : i32, i32, i32
  }
}

</mosaic_0001>

<bundles_post_ra>
// kernel: tpu_custom_call.1
= control target key start
LH: loop header
LB: loop body
LE: loop exit
PB: predicated region body
PF: predicated region fallthrough
CT: control target
= control target key end

     0   :  { %s1952_s0 = inlined_call_operand.hbm [shape: f32[2,1,200], index: 0, kind: input, shape index: {}]   ;;  %s1953_s1 = inlined_call_operand.vmem [shape: f32[2,8,100], index: 1, kind: input, shape index: {}]   ;;  %s1954_s2 = inlined_call_operand.vmem [shape: f32[200,200], index: 2, kind: input, shape index: {}]   ;;  %s1955_s3 = inlined_call_operand.vmem [shape: f32[100,200], index: 3, kind: input, shape index: {}]   ;;  %s1956_s4 = inlined_call_operand.hbm [shape: f32[1,200], index: 4, kind: input, shape index: {}]   ;;  %s1957_s5 = inlined_call_operand.hbm [shape: f32[200,200], index: 5, kind: input, shape index: {}]   ;;  %s1958_s6 = inlined_call_operand.hbm [shape: f32[1,200], index: 6, kind: input, shape index: {}]   ;;  %s1959_s7 = inlined_call_operand.vmem [shape: f32[200,2], index: 7, kind: input, shape index: {}]   ;;  %s1960_s8 = inlined_call_operand.vmem [shape: f32[1,2], index: 8, kind: input, shape index: {}]   ;;  %s1961_s9 = inlined_call_operand.vmem [shape: f32[2,8,2], index: 9, kind: output, shape index: {}]  }
   0x1   :  { %1966 = sst [smem:[#allocation12_spill]] %s1956_s4 }
   0x2   :  { %1967 = sst [smem:[#allocation13_spill]] %s1957_s5 }
   0x3   :  { %14 = vsyncpa [#allocation3], 0 }
   0x4   :  { %16 = vsyncpa [#allocation3 + $0x1], 0 }
   0x5   :  { %17 = vsyncpa [#allocation5], 0 }
   0x6   :  { %18 = vsyncpa [#allocation8], 0  ;;  %s1436_s30 = smov 0   ;;  %s1438_s10 = smov 0  }
   0x7   :  { %s1440_s11 = smov 0   ;;  %s1442_s12 = smov 0  }
   0x8   :  { %s1444_s13 = smov 0   ;;  %s1446_s14 = smov 0  }
   0x9 LB: > { %s1085_s15 = sadd.s32 4294967295, %s1377_s14   ;;  %p56_p0 = scmp.ne.s32.totalorder %s1361_s10, %s1357_s30  ;;  %s1377_s14 = sphi %s1446_s14, %s24_s14   ;;  %s1373_s13 = sphi %s1444_s13, %s1982_s13   ;;  %s1369_s12 = sphi %s1442_s12, %s1981_s12   ;;  %s1365_s11 = sphi %s1440_s11, %s1980_s11   ;;  %s1361_s10 = sphi %s1438_s10, %s1979_s10   ;;  %s1357_s30 = sphi %s1436_s30, %s1978_s30  }
   0xa   : > { %p1466_p1 = scmp.eq.s32.totalorder %s1085_s15, 0  ;;  %p1087_p2 = scmp.ge.s32.totalorder %s1377_s14, 1 }
   0xb   : > { %p270_p3 = scmp.lt.s32.totalorder %s1377_s14, 3  ;;  %s1379_s19 = smov [#allocation4]  }
   0xc   : > { %s1968_s16 = scalar_select %p1466_p1, 1, 0 }
   0xd   : > { %p1474_p4 = por %p1466_p1, %p56_p0  ;;  %p1478_p5 = pnand %p1087_p2, %p270_p3 }
   0xe   : > { %s289_s20 = sshll.u32 %s1379_s19, 4  ;;  %s1380_s21 = smov [#allocation6]   ;;  %s290_s20 = int_to_ptr.vmem [resolvable:$true] %s289_s20 }
   0xf   : > { %s1969_s17 = scalar_select %p1474_p4, 1, 0 }
  0x10   : > { %s1970_s18 = scalar_select %p1478_p5, 1, 0 }
  0x11   : > { %p1126_p6 = pneg %p1478_p5  ;;  %s299_s22 = sshll.u32 %s1380_s21, 4  ;;  %s300_s22 = int_to_ptr.vmem [resolvable:$true] %s299_s22 }
  0x12   : > { %s1381_s24 = smov [#allocation7]   ;;  %s1224_s26 = scalar_lea.vmem %s290_s20, 32 }
  0x13   : > { %p1486_p7 = pnand %p1126_p6, %p1466_p1  ;;  %s313_s25 = sshll.u32 %s1381_s24, 4  ;;  %s314_s25 = int_to_ptr.vmem [resolvable:$true] %s313_s25 }
  0x14   : > { %p1225_p9 = scmp.ne.s32.totalorder %s290_s20, %s1224_s26  ;;  %p1232_p12 = scmp.lt.s32.totalorder %s290_s20, %s290_s20 }
  0x15   : > { %p1215_p8 = pneg %p1486_p7  ;;  %p1233_p13 = scmp.lt.s32.totalorder %s1224_s26, %s1224_s26 }
  0x17   : > { %p1227_p10 = pnand %p1225_p9, %p1215_p8  ;;  %p1234_p0 = por %p1233_p13, %p1232_p12 }
  0x19   : > { %p1228_p11 = pneg %p1227_p10 }
  0x1b   : > { %p1235_p2 = pnand %p1234_p0, %p1228_p11 }
  0x1d   : > { %1238 = shalt.err (!%p1235_p2)
}
  0x1e   : > { %s1972_s4 = sld [smem:[#allocation12_spill]]  ;;  %s1250_s29 = scalar_lea.vmem %s300_s22, 6400 }
  0x1f   : > { %p1251_p3 = scmp.ne.s32.totalorder %s300_s22, %s1250_s29  ;;  %p1258_p9 = scmp.lt.s32.totalorder %s300_s22, %s300_s22 }
  0x20   : > { %p1259_p10 = scmp.lt.s32.totalorder %s1250_s29, %s1250_s29 }
  0x21   : > { %p1253_p6 = pnand %p1251_p3, %p1215_p8 }
  0x22   : > { %p1260_p4 = por %p1259_p10, %p1258_p9 }
  0x23   : > { %p1254_p1 = pneg %p1253_p6 }
  0x24   : > { %1129 = dma.hbm_to_vmem [thread:$0]  (!%p1486_p7), %s1972_s4, 32, %s290_s20, [#allocation5]  }
  0x25   : > { %p1261_p5 = pnand %p1260_p4, %p1254_p1 }
  0x27   : > { %1264 = shalt.err (!%p1261_p5)
}
  0x28   : > { %s1382_s30 = smov 256   ;;  %s1383_s15 = smov 16  }
  0x29   : > { %s1973_s5 = sld [smem:[#allocation13_spill]]  ;;  %s1276_s20 = scalar_lea.vmem %s314_s25, 32 }
  0x2a   : > { %p1277_p11 = scmp.ne.s32.totalorder %s314_s25, %s1276_s20  ;;  %p1284_p0 = scmp.lt.s32.totalorder %s314_s25, %s314_s25 }
  0x2b   : > { %p1285_p2 = scmp.lt.s32.totalorder %s1276_s20, %s1276_s20 }
  0x2c   : > { %p1279_p12 = pnand %p1277_p11, %p1215_p8 }
  0x2d   : > { %p1286_p1 = por %p1285_p2, %p1284_p0 }
  0x2e   : > { %p1280_p13 = pneg %p1279_p12 }
  0x2f   : > { %1132 = dma.hbm_to_vmem [thread:$0]  (!%p1486_p7), %s1973_s5, 6400, %s300_s22, [#allocation5], %s1382_s30, %s1382_s30, %s1383_s15  }
  0x30   : > { %p1287_p4 = pnand %p1286_p1, %p1280_p13 }
  0x32   : > { %1290 = shalt.err (!%p1287_p4)
}
  0x33   : > { %1135 = dma.hbm_to_vmem [thread:$0]  (!%p1486_p7), %s1958_s6, 32, %s314_s25, [#allocation8]  }
  0x34   : > { %s36_s22 = sadd.s32 1, %s1373_s13  ;;  %p50_p5 = scmp.ne.s32.totalorder %s1365_s11, %s1361_s10 }
  0x35   : > { %p38_p8 = scmp.ge.s32.totalorder %s36_s22, 2  ;;  %p51_p3 = scmp.eq.s32.totalorder %s1377_s14, 0 }
  0x36   : > { %s43_s27 = sadd.s32 1, %s1365_s11  ;;  %s330_s23 = sand.u32 1, %s1365_s11  }
  0x37   : > { %s1984_s22 = smov (%p38_p8, %s36_s22), 0  ;;  %p52_p6 = por %p51_p3, %p50_p5 }
  0x38   : > { %p1143_p9 = scmp.lt.s32.totalorder %s1377_s14, 2  ;;  %s40_s28 = ssub.s32 %s1373_s13, %s1984_s22 }
  0x39   : > { %s1092_s29 = sshll.u32 %s330_s23, 1  ;;  %p41_p10 = scmp.eq.s32.totalorder %s40_s28, 0 }
  0x3a   : > { %s1111_s30 = sshll.u32 %s1373_s13, 5  ;;  %s334_s15 = scalar_lea.vmem [#allocation2], %s1092_s29 }
  0x3b   : > { %s342_s19 = sshll.u32 %s334_s15, 4  ;;  %s340_s24 = scalar_lea.hbm %s1952_s0, %s1111_s30  ;;  %s343_s19 = int_to_ptr.vmem [resolvable:$true] %s342_s19 }
  0x3c   : > { %s1529_s21 = scalar_select %p41_p10, %s1365_s11, %s43_s27  }
  0x3d   : > { %p1534_p7 = pnand %p1143_p9, %p52_p6  ;;  %s331_s4 = scalar_lea.sflag [#allocation3], %s330_s23 }
  0x3e   : > { %s1304_s5 = scalar_lea.vmem %s343_s19, 32  ;;  %s1384_s28 = smov [#allocation2]  }
  0x3f   : > { %p1293_p11 = pneg %p1534_p7  ;;  %p1305_p12 = scmp.ne.s32.totalorder %s343_s19, %s1304_s5 }
  0x40   : > { %s1309_s27 = sshll.u32 %s1384_s28, 4  ;;  %s1310_s27 = int_to_ptr.vmem [resolvable:$false] %s1309_s27 }
  0x41   : > { %p1307_p13 = pnand %p1305_p12, %p1293_p11  ;;  %s1311_s29 = scalar_lea.vmem %s1310_s27, 64 }
  0x42   : > { %p1312_p2 = scmp.lt.s32.totalorder %s343_s19, %s1310_s27  ;;  %p1313_p1 = scmp.lt.s32.totalorder %s1311_s29, %s1304_s5 }
  0x43   : > { %p1308_p0 = pneg %p1307_p13 }
  0x44   : > { %p1314_p4 = por %p1313_p1, %p1312_p2 }
  0x46   : > { %p1315_p5 = pnand %p1314_p4, %p1308_p0 }
  0x48   : > { %1318 = shalt.err (!%p1315_p5)
}
  0x49   : > { %1139 = dma.hbm_to_vmem [thread:$0]  (!%p1534_p7), %s340_s24, 32, %s343_s19, %s331_s4  }
  0x4a   : > { %p1975_p8 = scmp.ne.s32.totalorder %s1970_s18, 0 }
  0x4b   : > { %s363_s23 = sand.u32 (!%p1975_p8), 1, %s1361_s10   ;;  %p1976_p3 = scmp.ne.s32.totalorder (!%p1975_p8), %s1969_s17, 0 }
  0x4c   : > { %361 = sbr.rel (%p1975_p8) target bundleno = 796 (0x31c), region = 56  ;;  %s1545_s30 = sshll.u32 (!%p1975_p8), %s363_s23, 1 }
  0x4d   : > { %s364_s15 = scalar_lea.sflag (!%p1975_p8), [#allocation3], %s363_s23  ;;  %s367_s25 = scalar_lea.vmem (!%p1975_p8), [#allocation2], %s1545_s30 }
  0x51   : > { %1344 = dma.done.wait (%p1976_p3), %s364_s15, 32  }
  0x52   : > { %1346 = vsyncadd (%p1976_p3), %s364_s15, 4294967264  ;;  %p1977_p6 = scmp.ne.s32.totalorder %s1968_s16, 0 }
  0x54   : > { %1348 = dma.done.wait (%p1977_p6), [#allocation5], 6432  }
  0x55   : > { %1350 = vsyncadd (%p1977_p6), [#allocation5], 4294960864 }
  0x56   : > { %1352 = dma.done.wait (%p1977_p6), [#allocation8], 32  }
  0x57   : > { %1354 = vsyncadd (%p1977_p6), [#allocation8], 4294967264  ;;  %v1385_v0 = vmov 0.0   ;;  %v469_v1 = vld [vmem:[%s1954_s2 + $0xf8] sm:$0xff]  ;;  %v468_v2 = vld [vmem:[%s1954_s2 + $0xf0] sm:$0xff]  ;;  %vm603_vm0 = vcmask 1043456   ;;  %v489_v35 = vlaneseq }
  0x58   : > { %674 = vmatprep.mubr.f32.mxu1 %v1385_v0  ;;  %v467_v3 = vld [vmem:[%s1954_s2 + $0xe8] sm:$0xff]  ;;  %501 = vmatprep.subr.mxu0 %v469_v1  ;;  %v466_v4 = vld [vmem:[%s1954_s2 + $0xe0] sm:$0xff]  ;;  %v465_v5 = vld [vmem:[%s1954_s2 + $0xd8] sm:$0xff]  ;;  %p423_p9 = scmp.lt.s32.totalorder %s1369_s12, 1  ;;  %vm498_vm1 = vcmask 588800   ;;  %vm599_vm2 = vcmask 818176  }
  0x59   : > { %502 = vmatpush1.msra.mxu0 %v468_v2  ;;  %v464_v6 = vld [vmem:[%s1954_s2 + $0xd0] sm:$0xff]  ;;  %v463_v7 = vld [vmem:[%s1954_s2 + $0xc8] sm:$0xff]  ;;  %v462_v8 = vld [vmem:[%s1954_s2 + $0xc0] sm:$0xff]  ;;  %v1688_v44 = vshrl.u32 %v489_v35, 7  ;;  %vm956_vm3 = vcmask 15360  }
  0x5a   : > { %503 = vmatprep.subr.mxu0 %v467_v3  ;;  %v461_v9 = vld [vmem:[%s1954_s2 + $0xb8] sm:$0xff]  ;;  %v460_v10 = vld [vmem:[%s1954_s2 + $0xb0] sm:$0xff]  ;;  %v459_v11 = vld [vmem:[%s1954_s2 + $0xa8] sm:$0xff]  ;;  %s1986_s12 = smov (!%p423_p9, %s1369_s12), 1 }
  0x5b   : > { %504 = vmatpush1.msra.mxu0 %v466_v4  ;;  %v598_v12 = vld [vmem:[%s1955_s3 + $0xc8] sm:$0xf]  ;;  %v458_v13 = vld [vmem:[%s1954_s2 + $0xa0] sm:$0xff]  ;;  %v596_v15 = vld [vmem:[%s1955_s3 + $0xb8] sm:$0xff]  ;;  %v1720_v53 = vsub.s32 1, %v1688_v44  ;;  %s1100_s24 = sshll.u32 %s1986_s12, 3 }
  0x5c   : > { %505 = vmatprep.subr.mxu0 %v465_v5  ;;  %1103 = vmatprep.subr.msk.mxu1 %vm603_vm0, %v598_v12  ;;  %v597_v14 = vld [vmem:[%s1955_s3 + $0xc0] sm:$0xf]  ;;  %v457_v16 = vld [vmem:[%s1954_s2 + $0x98] sm:$0xff]  ;;  %v595_v17 = vld [vmem:[%s1955_s3 + $0xb0] sm:$0xff]  ;;  %s429_s20 = scalar_lea.vmem %s1953_s1, %s1100_s24  ;;  %s436_s26 = scalar_lea.vmem %s1961_s9, %s1100_s24 }
  0x5d   : > { %506 = vmatpush1.msra.mxu0 %v464_v6  ;;  %1104 = vmatpush1.msk.msra.mxu1 %vm603_vm0, %v597_v14  ;;  %v456_v18 = vld [vmem:[%s1954_s2 + $0x90] sm:$0xff]  ;;  %v594_v19 = vld [vmem:[%s1955_s3 + $0xa8] sm:$0xff]  ;;  %v593_v20 = vld [vmem:[%s1955_s3 + $0xa0] sm:$0xff] }
  0x5e   : > { %507 = vmatprep.subr.mxu0 %v463_v7  ;;  %618 = vmatprep.subr.mxu1 %v596_v15  ;;  %v455_v21 = vld [vmem:[%s1954_s2 + $0x88] sm:$0xff]  ;;  %v592_v22 = vld [vmem:[%s1955_s3 + $0x98] sm:$0xff]  ;;  %v454_v23 = vld [vmem:[%s1954_s2 + $0x80] sm:$0xff] }
  0x5f   : > { %508 = vmatpush1.msra.mxu0 %v462_v8  ;;  %619 = vmatpush1.msra.mxu1 %v595_v17  ;;  %v591_v24 = vld [vmem:[%s1955_s3 + $0x90] sm:$0xff]  ;;  %v453_v25 = vld [vmem:[%s1954_s2 + $0x78] sm:$0xff]  ;;  %v590_v26 = vld [vmem:[%s1955_s3 + $0x88] sm:$0xff] }
  0x60   : > { %509 = vmatprep.subr.mxu0 %v461_v9  ;;  %620 = vmatprep.subr.mxu1 %v594_v19  ;;  %v452_v27 = vld [vmem:[%s1954_s2 + $0x70] sm:$0xff]  ;;  %v589_v28 = vld [vmem:[%s1955_s3 + $0x80] sm:$0xff]  ;;  %v451_v29 = vld [vmem:[%s1954_s2 + $0x68] sm:$0xff] }
  0x61   : > { %510 = vmatpush1.msra.mxu0 %v460_v10  ;;  %621 = vmatpush1.msra.mxu1 %v593_v20  ;;  %v588_v30 = vld [vmem:[%s1955_s3 + $0x78] sm:$0xff]  ;;  %v450_v31 = vld [vmem:[%s1954_s2 + $0x60] sm:$0xff]  ;;  %v587_v32 = vld [vmem:[%s1955_s3 + $0x70] sm:$0xff] }
  0x62   : > { %511 = vmatprep.subr.mxu0 %v459_v11  ;;  %622 = vmatprep.subr.mxu1 %v592_v22  ;;  %v449_v33 = vld [vmem:[%s1954_s2 + $0x58] sm:$0xff]  ;;  %v586_v34 = vld [vmem:[%s1955_s3 + $0x68] sm:$0xff]  ;;  %v448_v36 = vld [vmem:[%s1954_s2 + $0x50] sm:$0xff] }
  0x63   : > { %512 = vmatpush1.msra.mxu0 %v458_v13  ;;  %623 = vmatpush1.msra.mxu1 %v591_v24  ;;  %v585_v37 = vld [vmem:[%s1955_s3 + $0x60] sm:$0xff]  ;;  %v447_v38 = vld [vmem:[%s1954_s2 + $0x48] sm:$0xff]  ;;  %v584_v39 = vld [vmem:[%s1955_s3 + $0x58] sm:$0xff] }
  0x64   : > { %513 = vmatprep.subr.mxu0 %v457_v16  ;;  %624 = vmatprep.subr.mxu1 %v590_v26  ;;  %v446_v40 = vld [vmem:[%s1954_s2 + $0x40] sm:$0xff]  ;;  %v583_v41 = vld [vmem:[%s1955_s3 + $0x50] sm:$0xff]  ;;  %v445_v42 = vld [vmem:[%s1954_s2 + $0x38] sm:$0xff] }
  0x65   : > { %514 = vmatpush1.msra.mxu0 %v456_v18  ;;  %625 = vmatpush1.msra.mxu1 %v589_v28  ;;  %v582_v43 = vld [vmem:[%s1955_s3 + $0x48] sm:$0xff]  ;;  %v444_v45 = vld [vmem:[%s1954_s2 + $0x30] sm:$0xff]  ;;  %v581_v46 = vld [vmem:[%s1955_s3 + $0x40] sm:$0xff] }
  0x66   : > { %515 = vmatprep.subr.mxu0 %v455_v21  ;;  %626 = vmatprep.subr.mxu1 %v588_v30  ;;  %v443_v47 = vld [vmem:[%s1954_s2 + $0x28] sm:$0xff]  ;;  %v580_v48 = vld [vmem:[%s1955_s3 + $0x38] sm:$0xff]  ;;  %v442_v49 = vld [vmem:[%s1954_s2 + $0x20] sm:$0xff] }
  0x67   : > { %516 = vmatpush1.msra.mxu0 %v454_v23  ;;  %627 = vmatpush1.msra.mxu1 %v587_v32  ;;  %v579_v50 = vld [vmem:[%s1955_s3 + $0x30] sm:$0xff]  ;;  %v441_v51 = vld [vmem:[%s1954_s2 + $0x18] sm:$0xff]  ;;  %v578_v52 = vld [vmem:[%s1955_s3 + $0x28] sm:$0xff] }
  0x68   : > { %517 = vmatprep.subr.mxu0 %v453_v25  ;;  %628 = vmatprep.subr.mxu1 %v586_v34  ;;  %v440_v54 = vld [vmem:[%s1954_s2 + $0x10] sm:$0xff]  ;;  %v577_v55 = vld [vmem:[%s1955_s3 + $0x20] sm:$0xff]  ;;  %v439_v57 = vld [vmem:[%s1954_s2 + $0x8] sm:$0xff]  ;;  %v1802_v25 = vsub.s32 0, %v1688_v44 }
  0x69   : > { %518 = vmatpush1.msra.mxu0 %v452_v27  ;;  %629 = vmatpush1.msra.mxu1 %v585_v37  ;;  %v1730_v56 = vld [vmem:[%s367_s25] sm:$0x3]  ;;  %v576_v58 = vld [vmem:[%s1955_s3 + $0x18] sm:$0xff]  ;;  %v575_v60 = vld [vmem:[%s1955_s3 + $0x10] sm:$0xff] }
  0x6a   : > { %519 = vmatprep.subr.mxu0 %v451_v29  ;;  %630 = vmatprep.subr.mxu1 %v584_v39  ;;  %v438_v59 = vld [vmem:[%s1954_s2] sm:$0xff]  ;;  %v487_v61 = vld [vmem:[%s1954_s2 + $0x188] sm:$0xff]  ;;  %v496_v63 = vrot.slane %v1730_v56, %v1720_v53  ;;  %v485_v2 = vld [vmem:[%s1954_s2 + $0x178] sm:$0xff]  ;;  %v492_v34 = vrot.slane %v1730_v56, %v1802_v25 }
  0x6b   : > { %520 = vmatpush1.msra.mxu0 %v450_v31  ;;  %631 = vmatpush1.msra.mxu1 %v583_v41  ;;  %v574_v62 = vld [vmem:[%s1955_s3 + $0x8] sm:$0xff]  ;;  %v486_v1 = vld [vmem:[%s1954_s2 + $0x180] sm:$0xff]  ;;  %v484_v4 = vld [vmem:[%s1954_s2 + $0x170] sm:$0xff] }
  0x6c   : > { %521 = vmatprep.subr.mxu0 %v449_v33  ;;  %632 = vmatprep.subr.mxu1 %v582_v43  ;;  %v573_v3 = vld [vmem:[%s1955_s3] sm:$0xff]  ;;  %v483_v6 = vld [vmem:[%s1954_s2 + $0x168] sm:$0xff]  ;;  %v737_v9 = vld [vmem:[#allocation6 + $0xf0] sm:$0xff] }
  0x6d   : > { %522 = vmatpush1.msra.mxu0 %v448_v36  ;;  %633 = vmatpush1.msra.mxu1 %v581_v46  ;;  %v572_v5 = vld [vmem:[%s429_s20] sm:$0xff]  ;;  %v481_v10 = vld [vmem:[%s1954_s2 + $0x158] sm:$0xff]  ;;  %v736_v11 = vld [vmem:[#allocation6 + $0xe8] sm:$0xff] }
  0x6e   : > { %523 = vmatprep.subr.mxu0 %v447_v38  ;;  %634 = vmatprep.subr.mxu1 %v580_v48  ;;  %v738_v7 = vld [vmem:[#allocation6 + $0xf8] sm:$0xff]  ;;  %v480_v12 = vld [vmem:[%s1954_s2 + $0x150] sm:$0xff]  ;;  %v735_v13 = vld [vmem:[#allocation6 + $0xe0] sm:$0xff] }
  0x6f   : > { %524 = vmatpush1.msra.mxu0 %v446_v40  ;;  %635 = vmatpush1.msra.mxu1 %v579_v50  ;;  %v482_v8 = vld [vmem:[%s1954_s2 + $0x160] sm:$0xff]  ;;  %v479_v14 = vld [vmem:[%s1954_s2 + $0x148] sm:$0xff]  ;;  %v733_v17 = vld [vmem:[#allocation6 + $0xd0] sm:$0xff] }
  0x70   : > { %525 = vmatprep.subr.mxu0 %v445_v42  ;;  %636 = vmatprep.subr.mxu1 %v578_v52  ;;  %v734_v15 = vld [vmem:[#allocation6 + $0xd8] sm:$0xff]  ;;  %v732_v19 = vld [vmem:[#allocation6 + $0xc8] sm:$0xff]  ;;  %v731_v21 = vld [vmem:[#allocation6 + $0xc0] sm:$0xff] }
  0x71   : > { %526 = vmatpush1.msra.mxu0 %v444_v45  ;;  %637 = vmatpush1.msra.mxu1 %v577_v55  ;;  %v478_v16 = vld [vmem:[%s1954_s2 + $0x140] sm:$0xff]  ;;  %v477_v18 = vld [vmem:[%s1954_s2 + $0x138] sm:$0xff]  ;;  %v476_v20 = vld [vmem:[%s1954_s2 + $0x130] sm:$0xff] }
  0x72   : > { %527 = vmatprep.subr.mxu0 %v443_v47  ;;  %638 = vmatprep.subr.mxu1 %v576_v58  ;;  %v475_v22 = vld [vmem:[%s1954_s2 + $0x128] sm:$0xff]  ;;  %v730_v23 = vld [vmem:[#allocation6 + $0xb8] sm:$0xff]  ;;  %v729_v26 = vld [vmem:[#allocation6 + $0xb0] sm:$0xff] }
  0x73   : > { %528 = vmatpush1.msra.mxu0 %v442_v49  ;;  %639 = vmatpush1.msra.mxu1 %v575_v60  ;;  %v474_v24 = vld [vmem:[%s1954_s2 + $0x120] sm:$0xff]  ;;  %v473_v27 = vld [vmem:[%s1954_s2 + $0x118] sm:$0xff]  ;;  %v728_v28 = vld [vmem:[#allocation6 + $0xa8] sm:$0xff] }
  0x74   : > { %529 = vmatprep.subr.mxu0 %v441_v51  ;;  %640 = vmatprep.subr.mxu1 %v574_v62  ;;  %v472_v29 = vld [vmem:[%s1954_s2 + $0x110] sm:$0xff]  ;;  %v727_v30 = vld [vmem:[#allocation6 + $0xa0] sm:$0xff]  ;;  %v726_v32 = vld [vmem:[#allocation6 + $0x98] sm:$0xff] }
  0x75   : > { %530 = vmatpush1.msra.mxu0 %v440_v54  ;;  %1102 = vmatprep.mubr.msk.f32.mxu0 %vm498_vm1, %v496_v63  ;;  %v471_v31 = vld [vmem:[%s1954_s2 + $0x108] sm:$0xff]  ;;  %v470_v33 = vld [vmem:[%s1954_s2 + $0x100] sm:$0xff]  ;;  %v725_v35 = vld [vmem:[#allocation6 + $0x90] sm:$0xff] }
  0x76   : > { %531 = vmatprep.subr.mxu0 %v439_v57  ;;  %641 = vmatpush1.msra.mxu1 %v573_v3  ;;  %v724_v36 = vld [vmem:[#allocation6 + $0x88] sm:$0xff]  ;;  %v723_v37 = vld [vmem:[#allocation6 + $0x80] sm:$0xff]  ;;  %v722_v38 = vld [vmem:[#allocation6 + $0x78] sm:$0xff] }
  0x77   : > { %532 = vmatpush1.msra.mxu0 %v438_v59  ;;  %1105 = vmatmul.mubr.msk.f32.vlgmr.msra.gmra.mxu1 %vm599_vm2, %v572_v5  ;;  %v721_v39 = vld [vmem:[#allocation6 + $0x70] sm:$0xff]  ;;  %v720_v40 = vld [vmem:[#allocation6 + $0x68] sm:$0xff]  ;;  %v719_v41 = vld [vmem:[#allocation6 + $0x60] sm:$0xff] }
  0x78   : > { %547 = vmatprep.subr.mxu0 %v487_v61  ;;  %772 = vmatprep.subr.mxu1 %v738_v7  ;;  %v718_v42 = vld [vmem:[#allocation6 + $0x58] sm:$0xff]  ;;  %v717_v43 = vld [vmem:[#allocation6 + $0x50] sm:$0xff]  ;;  %v716_v44 = vld [vmem:[#allocation6 + $0x48] sm:$0xff] }
  0x79   : > { %548 = vmatpush2.msra.mxu0 %v486_v1  ;;  %773 = vmatpush1.msra.mxu1 %v737_v9  ;;  %v715_v45 = vld [vmem:[#allocation6 + $0x40] sm:$0xff]  ;;  %v714_v46 = vld [vmem:[#allocation6 + $0x38] sm:$0xff]  ;;  %v713_v47 = vld [vmem:[#allocation6 + $0x30] sm:$0xff] }
  0x7a   : > { %549 = vmatprep.subr.mxu0 %v485_v2  ;;  %774 = vmatprep.subr.mxu1 %v736_v11  ;;  %v712_v48 = vld [vmem:[#allocation6 + $0x28] sm:$0xff]  ;;  %v711_v49 = vld [vmem:[#allocation6 + $0x20] sm:$0xff]  ;;  %v710_v50 = vld [vmem:[#allocation6 + $0x18] sm:$0xff] }
  0x7b   : > { %550 = vmatpush2.msra.mxu0 %v484_v4  ;;  %775 = vmatpush1.msra.mxu1 %v735_v13  ;;  %v709_v51 = vld [vmem:[#allocation6 + $0x10] sm:$0xff]  ;;  %v708_v52 = vld [vmem:[#allocation6 + $0x8] sm:$0xff]  ;;  %v707_v54 = vld [vmem:[#allocation6] sm:$0xff] }
  0x7c   : > { %551 = vmatprep.subr.mxu0 %v483_v6  ;;  %776 = vmatprep.subr.mxu1 %v734_v15  ;;  %v756_v55 = vld [vmem:[#allocation6 + $0x188] sm:$0xff]  ;;  %v755_v56 = vld [vmem:[#allocation6 + $0x180] sm:$0xff]  ;;  %v754_v57 = vld [vmem:[#allocation6 + $0x178] sm:$0xff] }
  0x7d   : > { %552 = vmatpush2.msra.mxu0 %v482_v8  ;;  %777 = vmatpush1.msra.mxu1 %v733_v17  ;;  %v753_v58 = vld [vmem:[#allocation6 + $0x170] sm:$0xff]  ;;  %v752_v59 = vld [vmem:[#allocation6 + $0x168] sm:$0xff]  ;;  %v751_v60 = vld [vmem:[#allocation6 + $0x160] sm:$0xff] }
  0x7e   : > { %553 = vmatprep.subr.mxu0 %v481_v10  ;;  %778 = vmatprep.subr.mxu1 %v732_v19  ;;  %v750_v61 = vld [vmem:[#allocation6 + $0x158] sm:$0xff]  ;;  %v749_v62 = vld [vmem:[#allocation6 + $0x150] sm:$0xff]  ;;  %v748_v63 = vld [vmem:[#allocation6 + $0x148] sm:$0xff] }
  0x7f   : > { %554 = vmatpush2.msra.mxu0 %v480_v12  ;;  %779 = vmatpush1.msra.mxu1 %v731_v21  ;;  %v747_v1 = vld [vmem:[#allocation6 + $0x140] sm:$0xff]  ;;  %v746_v2 = vld [vmem:[#allocation6 + $0x138] sm:$0xff]  ;;  %v745_v3 = vld [vmem:[#allocation6 + $0x130] sm:$0xff] }
  0x80   : > { %555 = vmatprep.subr.mxu0 %v479_v14  ;;  %780 = vmatprep.subr.mxu1 %v730_v23  ;;  %v744_v4 = vld [vmem:[#allocation6 + $0x128] sm:$0xff]  ;;  %v743_v5 = vld [vmem:[#allocation6 + $0x120] sm:$0xff]  ;;  %v742_v6 = vld [vmem:[#allocation6 + $0x118] sm:$0xff] }
  0x81   : > { %556 = vmatpush2.msra.mxu0 %v478_v16  ;;  %781 = vmatpush1.msra.mxu1 %v729_v26  ;;  %v741_v7 = vld [vmem:[#allocation6 + $0x110] sm:$0xff]  ;;  %v740_v8 = vld [vmem:[#allocation6 + $0x108] sm:$0xff]  ;;  %v739_v9 = vld [vmem:[#allocation6 + $0x100] sm:$0xff] }
  0x82   : > { %557 = vmatprep.subr.mxu0 %v477_v18  ;;  %782 = vmatprep.subr.mxu1 %v728_v28  ;;  %v860_v10 = vld [vmem:[%s1959_s7 + $0x78] sm:$0xff]  ;;  %v859_v11 = vld [vmem:[%s1959_s7 + $0x70] sm:$0xff]  ;;  %v858_v12 = vld [vmem:[%s1959_s7 + $0x68] sm:$0xff] }
  0x83   : > { %558 = vmatpush2.msra.mxu0 %v476_v20  ;;  %783 = vmatpush1.msra.mxu1 %v727_v30  ;;  %v857_v13 = vld [vmem:[%s1959_s7 + $0x60] sm:$0xff]  ;;  %v856_v14 = vld [vmem:[%s1959_s7 + $0x58] sm:$0xff]  ;;  %v855_v15 = vld [vmem:[%s1959_s7 + $0x50] sm:$0xff] }
  0x84   : > { %559 = vmatprep.subr.mxu0 %v475_v22  ;;  %784 = vmatprep.subr.mxu1 %v726_v32  ;;  %v854_v16 = vld [vmem:[%s1959_s7 + $0x48] sm:$0xff]  ;;  %v853_v17 = vld [vmem:[%s1959_s7 + $0x40] sm:$0xff]  ;;  %v852_v18 = vld [vmem:[%s1959_s7 + $0x38] sm:$0xff] }
  0x85   : > { %560 = vmatpush2.msra.mxu0 %v474_v24  ;;  %785 = vmatpush1.msra.mxu1 %v725_v35  ;;  %v851_v19 = vld [vmem:[%s1959_s7 + $0x30] sm:$0xff]  ;;  %v850_v20 = vld [vmem:[%s1959_s7 + $0x28] sm:$0xff]  ;;  %v849_v21 = vld [vmem:[%s1959_s7 + $0x20] sm:$0xff] }
  0x86   : > { %561 = vmatprep.subr.mxu0 %v473_v27  ;;  %786 = vmatprep.subr.mxu1 %v724_v36  ;;  %v848_v22 = vld [vmem:[%s1959_s7 + $0x18] sm:$0xff]  ;;  %v847_v23 = vld [vmem:[%s1959_s7 + $0x10] sm:$0xff]  ;;  %v846_v24 = vld [vmem:[%s1959_s7 + $0x8] sm:$0xff] }
  0x87   : > { %562 = vmatpush2.msra.mxu0 %v472_v29  ;;  %787 = vmatpush1.msra.mxu1 %v723_v37  ;;  %v691_v26 = vld [vmem:[#allocation4] sm:$0x3] }
  0x88   : > { %563 = vmatprep.subr.mxu0 %v471_v31  ;;  %788 = vmatprep.subr.mxu1 %v722_v38  ;;  %v696_v30 = vrot.slane %v691_v26, %v1802_v25 }
  0x89   : > { %564 = vmatpush2.msra.mxu0 %v470_v33  ;;  %789 = vmatpush1.msra.mxu1 %v721_v39 }
  0x8a   : > { %566 = vmatmul.mubr.f32.vlgmr.msra.gmra.mxu0 %v492_v34  ;;  %880 = vmatprep.subr.mxu0 %v1385_v0  ;;  %v700_v34 = vrot.slane %v691_v26, %v1720_v53 }
  0x8b   : > { %790 = vmatprep.subr.mxu1 %v720_v40  ;;  %881 = vmatpush1.msra.mxu0 %v860_v10 }
  0x8c   : > { %791 = vmatpush1.msra.mxu1 %v719_v41  ;;  %882 = vmatprep.subr.mxu0 %v1385_v0  ;;  %v845_v41 = vld [vmem:[%s1959_s7] sm:$0xff] }
  0x8d   : > { %792 = vmatprep.subr.mxu1 %v718_v42  ;;  %883 = vmatpush1.msra.mxu0 %v859_v11  ;;  %v869_v42 = vld [vmem:[%s1959_s7 + $0xc0] sm:$0xff] }
  0x8e   : > { %793 = vmatpush1.msra.mxu1 %v717_v43  ;;  %884 = vmatprep.subr.mxu0 %v1385_v0  ;;  %v868_v43 = vld [vmem:[%s1959_s7 + $0xb8] sm:$0xff] }
  0x8f   : > { %794 = vmatprep.subr.mxu1 %v716_v44  ;;  %885 = vmatpush1.msra.mxu0 %v858_v12  ;;  %v867_v44 = vld [vmem:[%s1959_s7 + $0xb0] sm:$0xff] }
  0x90   : > { %795 = vmatpush1.msra.mxu1 %v715_v45  ;;  %886 = vmatprep.subr.mxu0 %v1385_v0  ;;  %v866_v45 = vld [vmem:[%s1959_s7 + $0xa8] sm:$0xff] }
  0x91   : > { %796 = vmatprep.subr.mxu1 %v714_v46  ;;  %887 = vmatpush1.msra.mxu0 %v857_v13  ;;  %v865_v46 = vld [vmem:[%s1959_s7 + $0xa0] sm:$0xff] }
  0x92   : > { %797 = vmatpush1.msra.mxu1 %v713_v47  ;;  %888 = vmatprep.subr.mxu0 %v1385_v0  ;;  %v864_v47 = vld [vmem:[%s1959_s7 + $0x98] sm:$0xff] }
  0x93   : > { %798 = vmatprep.subr.mxu1 %v712_v48  ;;  %889 = vmatpush1.msra.mxu0 %v856_v14  ;;  %v863_v48 = vld [vmem:[%s1959_s7 + $0x90] sm:$0xff] }
  0x94   : > { %799 = vmatpush1.msra.mxu1 %v711_v49  ;;  %890 = vmatprep.subr.mxu0 %v1385_v0  ;;  %v862_v49 = vld [vmem:[%s1959_s7 + $0x88] sm:$0xff] }
  0x95   : > { %800 = vmatprep.subr.mxu1 %v710_v50  ;;  %891 = vmatpush1.msra.mxu0 %v855_v15  ;;  %v861_v50 = vld [vmem:[%s1959_s7 + $0x80] sm:$0xff] }
  0x96   : > { %801 = vmatpush1.msra.mxu1 %v709_v51  ;;  %892 = vmatprep.subr.mxu0 %v1385_v0  ;;  %v757_v51 = vld [vmem:[#allocation7] sm:$0x3] }
  0x97   : > { %802 = vmatprep.subr.mxu1 %v708_v52  ;;  %893 = vmatpush1.msra.mxu0 %v854_v16  ;;  %v762_v52 = vrot.slane %v757_v51, %v1802_v25 }
  0x98   : > { %803 = vmatpush1.msra.mxu1 %v707_v54  ;;  %894 = vmatprep.subr.mxu0 %v1385_v0  ;;  %v766_v54 = vrot.slane %v757_v51, %v1720_v53 }
  0x99   : > { %818 = vmatprep.subr.mxu1 %v756_v55  ;;  %895 = vmatpush1.msra.mxu0 %v853_v17 }
  0x9a   : > { %819 = vmatpush2.msra.mxu1 %v755_v56  ;;  %896 = vmatprep.subr.mxu0 %v1385_v0 }
  0x9b   : > { %820 = vmatprep.subr.mxu1 %v754_v57  ;;  %897 = vmatpush1.msra.mxu0 %v852_v18 }
  0x9c   : > { %821 = vmatpush2.msra.mxu1 %v753_v58  ;;  %898 = vmatprep.subr.mxu0 %v1385_v0 }
  0x9d   : > { %822 = vmatprep.subr.mxu1 %v752_v59  ;;  %899 = vmatpush1.msra.mxu0 %v851_v19 }
  0x9e   : > { %823 = vmatpush2.msra.mxu1 %v751_v60  ;;  %900 = vmatprep.subr.mxu0 %v1385_v0 }
  0x9f   : > { %824 = vmatprep.subr.mxu1 %v750_v61  ;;  %901 = vmatpush1.msra.mxu0 %v850_v20 }
  0xa0   : > { %825 = vmatpush2.msra.mxu1 %v749_v62  ;;  %902 = vmatprep.subr.mxu0 %v1385_v0 }
  0xa1   : > { %826 = vmatprep.subr.mxu1 %v748_v63  ;;  %903 = vmatpush1.msra.mxu0 %v849_v21 }
  0xa2   : > { %827 = vmatpush2.msra.mxu1 %v747_v1  ;;  %904 = vmatprep.subr.mxu0 %v1385_v0 }
  0xa3   : > { %828 = vmatprep.subr.mxu1 %v746_v2  ;;  %905 = vmatpush1.msra.mxu0 %v848_v22 }
  0xa4   : > { %829 = vmatpush2.msra.mxu1 %v745_v3  ;;  %906 = vmatprep.subr.mxu0 %v1385_v0 }
  0xa5   : > { %830 = vmatprep.subr.mxu1 %v744_v4  ;;  %907 = vmatpush1.msra.mxu0 %v847_v23 }
  0xa6   : > { %831 = vmatpush2.msra.mxu1 %v743_v5  ;;  %908 = vmatprep.subr.mxu0 %v1385_v0 }
  0xa7   : > { %832 = vmatprep.subr.mxu1 %v742_v6  ;;  %909 = vmatpush1.msra.mxu0 %v846_v24 }
  0xa8   : > { %833 = vmatpush2.msra.mxu1 %v741_v7  ;;  %910 = vmatprep.subr.mxu0 %v1385_v0 }
  0xa9   : > { %834 = vmatprep.subr.mxu1 %v740_v8  ;;  %911 = vmatpush1.msra.mxu0 %v845_v41 }
  0xaa   : > { %835 = vmatpush2.msra.mxu1 %v739_v9  ;;  %926 = vmatprep.subr.mxu0 %v1385_v0 }
  0xab   : > { %927 = vmatpush2.msra.mxu0 %v869_v42 }
  0xac   : > { %928 = vmatprep.subr.mxu0 %v1385_v0 }
  0xad   : > { %929 = vmatpush2.msra.mxu0 %v868_v43 }
  0xae   : > { %930 = vmatprep.subr.mxu0 %v1385_v0 }
  0xaf   : > { %931 = vmatpush2.msra.mxu0 %v867_v44 }
  0xb0   : > { %932 = vmatprep.subr.mxu0 %v1385_v0 }
  0xb1   : > { %933 = vmatpush2.msra.mxu0 %v866_v45 }
  0xb2   : > { %934 = vmatprep.subr.mxu0 %v1385_v0 }
  0xb3   : > { %935 = vmatpush2.msra.mxu0 %v865_v46 }
  0xb4   : > { %936 = vmatprep.subr.mxu0 %v1385_v0 }
  0xb5   : > { %937 = vmatpush2.msra.mxu0 %v864_v47 }
  0xb6   : > { %938 = vmatprep.subr.mxu0 %v1385_v0 }
  0xb7   : > { %939 = vmatpush2.msra.mxu0 %v863_v48 }
  0xb8   : > { %940 = vmatprep.subr.mxu0 %v1385_v0 }
  0xb9   : > { %941 = vmatpush2.msra.mxu0 %v862_v49 }
  0xba   : > { %942 = vmatprep.subr.mxu0 %v1385_v0  ;;  %v1107_v0 = vld [vmem:[%s1960_s8] ss:$0 sm:$0xff] }
  0xbb   : > { %943 = vmatpush2.msra.mxu0 %v861_v50 }
 0x137   : > { %v676_v28 = vpop.f32.mrf.mxu1 }
 0x139   : > { %v678_v35 = vpop.f32.mrf.mxu1 }
 0x14a   : > { %v567_v27 = vpop.f32.mrf.mxu0 }
 0x14b   : > { %v684_v29 = vrot.slane %v567_v27, %v1802_v25 }
 0x14c   : > { %v569_v31 = vpop.f32.mrf.mxu0 }
 0x14d   : > { %v689_v32 = vadd.f32 %v684_v29, %v676_v28  ;;  %v688_v33 = vrot.slane %v569_v31, %v1802_v25 }
 0x14f   : > { %v690_v36 = vadd.f32 %v688_v33, %v678_v35  ;;  %v703_v37 = vadd.f32 %v696_v30, %v689_v32 }
 0x151   : > { %v704_v38 = vadd.f32 %v700_v34, %v690_v36 }
 0x153   : > { %1201 = vtanh.f32 %v704_v38 }
 0x154   : > { %1203 = vtanh.f32 %v703_v37 }
 0x160   : > { %v1202_v39 = vpop.eup %1201 }
 0x161   : > { %v1204_v40 = vpop.eup %1203  ;;  %1106 = vmatprep.mubr.msk.f32.mxu1 %vm498_vm1, %v1202_v39 }
 0x162   : > { %837 = vmatmul.mubr.f32.vlgmr.msra.gmra.mxu1 %v1204_v40 }
 0x222   : > { %v838_v55 = vpop.f32.mrf.mxu1 }
 0x223   : > { %v839_v56 = vadd.f32 %v838_v55, %v762_v52 }
 0x224   : > { %v840_v57 = vpop.f32.mrf.mxu1 }
 0x225   : > { %v841_v58 = vadd.f32 %v840_v57, %v766_v54 }
 0x227   : > { %1205 = vtanh.f32 %v841_v58 }
 0x228   : > { %1207 = vtanh.f32 %v839_v56 }
 0x234   : > { %v1206_v59 = vpop.eup %1205 }
 0x235   : > { %v1208_v60 = vpop.eup %1207  ;;  %1108 = vmatprep.mubr.msk.f32.mxu0 %vm498_vm1, %v1206_v59 }
 0x236   : > { %945 = vmatmul.mubr.f32.vlgmr.msra.gmra.mxu0 %v1208_v60 }
 0x2f6   : > { %v946_v61 = vpop.f32.mrf.mxu0 }
 0x2f7   : > { %v947_v25 = vadd.f32 %v1107_v0, %v946_v61 }
 0x2f8   : > { %v948_v62 = vpop.f32.mrf.mxu0 }
 0x2f9   : > { %v950_v53 = vsub.f32 0.0, %v947_v25 }
 0x2fb   : > { %v951_v63 = vmul.f32 1.442695, %v950_v53 }
 0x2fd   : > { %1209 = vpow2.f32 %v951_v63 }
 0x30a   : > { %v1210_v1 = vpop.eup %1209 }
 0x30b   : > { %v953_v2 = vadd.f32 1.0, %v1210_v1 }
 0x30d   : > { %1211 = vrcp.f32 %v953_v2 }
 0x31a   : > { %v1212_v3 = vpop.eup %1211 }
 0x31b   : > { %957 = vst.msk [vmem:[%s436_s26] sm:$0xff] %vm956_vm3, %v1212_v3 }
 0x31c PF: > { %s24_s14 = sadd.s32 1, %s1377_s14   ;;  %s1978_s30 = smov %s1361_s10 }
 0x31d   : > { %p21_p10 = scmp.ge.s32.totalorder %s24_s14, 4   ;;  %s1979_s10 = smov %s1365_s11 }
 0x31e   : > { %s1980_s11 = smov %s1529_s21  ;;  %s1981_s12 = smov %s1373_s13 }
 0x31f   : > { %s1982_s13 = smov %s1984_s22  ;;  %23 = sbr.rel (!%p21_p10) target bundleno = 9 (0x9), region = 111 }
 0x324   :  { %983 = vsyncpa [#allocation3], 1 }
 0x325   :  { %985 = vsyncpa [#allocation3 + $0x1], 1 }
 0x326   :  { %986 = vsyncpa [#allocation5], 1 }
 0x327   :  { %987 = vsyncpa [#allocation8], 1 }

</bundles_post_ra>
